<compile_context>
chip_gen: v7x
topology: tpu7x:2x2x1
jax: 0.10.0
libtpu: 0.0.40
codegen_flags: <defaults>
</compile_context>

<pallas_src>
import functools

import numpy as np
import jax
import jax.numpy as jnp
from jax.experimental import pallas as pl
from jax.experimental.pallas import tpu as pltpu


def _round_up(x, m):
    return ((x + m - 1) // m) * m


def _ltv_tile_kernel(origin_ref, illum_ref, out_ref, *, alpha, eps, tile_h, height):
    t = pl.program_id(1)

    r = origin_ref[0, 0, :, :].astype(jnp.float32)
    g = origin_ref[0, 1, :, :].astype(jnp.float32)
    b = origin_ref[0, 2, :, :].astype(jnp.float32)
    ill = illum_ref[0, 0, :, :].astype(jnp.float32)

    # Grayscale intensity + log.  Garbage rows of a ragged last tile may turn
    # into NaN/Inf here; they are removed below by a select (jnp.where), never
    # by a multiply, so they cannot leak into the sums.
    L = jnp.log(r * 0.299 + g * 0.587 + b * 0.114 + eps)

    # Rows are valid iff their global index is <= H-2: drops the last image row
    # (reference uses [:-1] windows) and every padding row of the ragged tile.
    row = jax.lax.broadcasted_iota(jnp.int32, (tile_h, 1), 0) + t * tile_h
    row_ok = row <= height - 2

    Lc = L[:, :-1]
    Ic = ill[:, :-1]

    # ---- x-direction: (r, c) vs (r, c+1), rows 0..H-2, cols 0..W-2 ----------
    dLx = Lc - L[:, 1:]
    dIx = Ic - ill[:, 1:]
    # |d|**alpha as exp(alpha * log|d|); exp(-inf) == 0 reproduces pow(0, a)=0.
    wx = pl.reciprocal(jnp.exp(alpha * jnp.log(jnp.abs(dLx))) + eps)
    x_sum = jnp.sum(jnp.where(row_ok, wx * dIx * dIx, 0.0), axis=0, keepdims=True)

    # ---- y-direction: (r, c) vs (r+1, c), pairs fully inside this tile ------
    dLy = Lc[:-1, :] - L[1:, :-1]
    dIy = Ic[:-1, :] - ill[1:, :-1]
    wy = pl.reciprocal(jnp.exp(alpha * jnp.log(jnp.abs(dLy))) + eps)
    y_sum = jnp.sum(jnp.where(row_ok[:-1, :], wy * dIy * dIy, 0.0),
                    axis=0, keepdims=True)

    out_ref[0, 0, :, :] = x_sum + y_sum


def _choose_tile_h(H, W, B):
    lanes = _round_up(W, 128)                 # physical lane footprint in VMEM
    plane_budget = 5 * 256 * 1024             # ~1.25 MiB per f32 tile plane (v7x-safe)
    budget_rows = max(8, plane_budget // (4 * lanes))
    if H <= budget_rows:
        tile_h = H                            # single row tile (full-dim block)
        if B == 1 and H >= 16:                # keep >= 2 grid steps (v7x: 2 TCs)
            tile_h = _round_up(-(-H // 2), 8)
    else:
        tile_h = (budget_rows // 8) * 8
    return tile_h


def ltv_loss(origin, illumination, weight, *, alpha=1.2, beta=1.5, eps=1e-4,
             tile_h=None):
    """Pallas implementation of LTVloss.forward.

    origin:       [B, 3, H, W]   (any float dtype; upcast to f32 inside kernel)
    illumination: [B, 1, H, W]
    weight:       scalar
    returns:      scalar float32 loss
    """
    origin = jnp.asarray(origin)
    illumination = jnp.asarray(illumination)
    B, C, H, W = origin.shape
    assert C == 3
    assert illumination.shape == (B, 1, H, W)
    assert H >= 2 and W >= 2

    if tile_h is None:
        tile_h = _choose_tile_h(H, W, B)
    else:
        tile_h = min(int(tile_h), H)
        if tile_h < H:
            tile_h = max(8, (tile_h // 8) * 8)
    n_th = -(-H // tile_h)

    kernel = functools.partial(
        _ltv_tile_kernel, alpha=float(alpha), eps=float(eps),
        tile_h=tile_h, height=H)

    partials = pl.pallas_call(
        kernel,
        out_shape=jax.ShapeDtypeStruct((B, n_th, 1, W - 1), jnp.float32),
        grid_spec=pltpu.PrefetchScalarGridSpec(
            num_scalar_prefetch=0,
            grid=(B, n_th),
            in_specs=[
                pl.BlockSpec((1, 3, tile_h, W), lambda bi, ti: (bi, 0, ti, 0)),
                pl.BlockSpec((1, 1, tile_h, W), lambda bi, ti: (bi, 0, ti, 0)),
            ],
            out_specs=pl.BlockSpec((1, 1, 1, W - 1), lambda bi, ti: (bi, ti, 0, 0)),
        ),
        compiler_params=pltpu.CompilerParams(
            dimension_semantics=("parallel", "parallel"),
            vmem_limit_bytes=40 * 1024 * 1024,
        ),
    )(origin, illumination)

    total = jnp.sum(partials)

    # y-direction terms whose (row, row+1) pair straddles a row-tile boundary
    # cannot be formed inside one tile; there are only (n_th - 1) such rows per
    # image, so add them with a tiny plain-JAX epilogue (beta hoisted here too).
    if n_th > 1:
        br = np.arange(1, n_th) * tile_h - 1          # static rows, all <= H-2
        o0 = origin[:, :, br, :].astype(jnp.float32)
        o1 = origin[:, :, br + 1, :].astype(jnp.float32)
        L0 = jnp.log(o0[:, 0] * 0.299 + o0[:, 1] * 0.587 + o0[:, 2] * 0.114 + eps)
        L1 = jnp.log(o1[:, 0] * 0.299 + o1[:, 1] * 0.587 + o1[:, 2] * 0.114 + eps)
        i0 = illumination[:, 0, br, :].astype(jnp.float32)
        i1 = illumination[:, 0, br + 1, :].astype(jnp.float32)
        wyb = 1.0 / (jnp.power(jnp.abs(L0 - L1), alpha) + eps)
        total = total + jnp.sum((wyb * (i0 - i1) ** 2)[..., : W - 1])

    count = B * (H - 1) * (W - 1)
    return total * (beta / (2.0 * count)) * weight


def _ltv_loss_ref(origin, illumination, weight, *, alpha=1.2, beta=1.5, eps=1e-4):
    """Pure-JAX reference mirroring the PyTorch forward."""
    I = (origin[:, 0:1] * 0.299 + origin[:, 1:2] * 0.587 + origin[:, 2:3] * 0.114)
    L = jnp.log(I + eps)
    dx = L[:, :, :-1, :-1] - L[:, :, :-1, 1:]
    dy = L[:, :, :-1, :-1] - L[:, :, 1:, :-1]
    dx = beta / (jnp.power(jnp.abs(dx), alpha) + eps)
    dy = beta / (jnp.power(jnp.abs(dy), alpha) + eps)
    x_loss = dx * (illumination[:, :, :-1, :-1] - illumination[:, :, :-1, 1:]) ** 2
    y_loss = dy * (illumination[:, :, :-1, :-1] - illumination[:, :, 1:, :-1]) ** 2
    return jnp.mean(x_loss + y_loss) / 2.0 * weight


if __name__ == "__main__":
    key = jax.random.PRNGKey(0)
    k1, k2, k3, k4, k5, k6 = jax.random.split(key, 6)
    weight = 1.0

    # 1) Small single-tile case (unaligned W=16).
    B, H, W = 2, 16, 16
    origin = jax.random.uniform(k1, (B, 3, H, W), dtype=jnp.float32)
    illum = jax.random.uniform(k2, (B, 1, H, W), dtype=jnp.float32)
    out = jax.block_until_ready(ltv_loss(origin, illum, weight))
    ref = jax.block_until_ready(_ltv_loss_ref(origin, illum, weight))
    assert jnp.allclose(out, ref, rtol=1e-2, atol=1e-6), (out, ref)

    # 2) Multi-tile: forced tile_h=16 -> ragged last row tile, boundary rows,
    #    unaligned W=200.
    B2, H2, W2 = 2, 40, 200
    origin2 = jax.random.uniform(k3, (B2, 3, H2, W2), dtype=jnp.float32)
    illum2 = jax.random.uniform(k4, (B2, 1, H2, W2), dtype=jnp.float32)
    out2 = jax.block_until_ready(ltv_loss(origin2, illum2, weight, tile_h=16))
    ref2 = jax.block_until_ready(_ltv_loss_ref(origin2, illum2, weight))
    assert jnp.allclose(out2, ref2, rtol=1e-2, atol=1e-6), (out2, ref2)

    # 3) B == 1, lane-aligned W, automatic tile_h (forced to >= 2 grid steps).
    B3, H3, W3 = 1, 48, 256
    origin3 = jax.random.uniform(k5, (B3, 3, H3, W3), dtype=jnp.float32)
    illum3 = jax.random.uniform(k6, (B3, 1, H3, W3), dtype=jnp.float32)
    out3 = jax.block_until_ready(ltv_loss(origin3, illum3, weight))
    ref3 = jax.block_until_ready(_ltv_loss_ref(origin3, illum3, weight))
    assert jnp.allclose(out3, ref3, rtol=1e-2, atol=1e-6), (out3, ref3)

    print("KERNEL_OK")
</pallas_src>

<mosaic_0001>
module attributes {stable_mosaic.version = 11 : i64} {
  func.func @_ltv_tile_kernel(%arg0: i32, %arg1: i32, %arg2: memref<1x3x16x16xf32, #tpu.memory_space<vmem>>, %arg3: memref<1x1x16x16xf32, #tpu.memory_space<vmem>>, %arg4: memref<1x1x1x15xf32, #tpu.memory_space<vmem>>) attributes {dimension_semantics = [#tpu.dimension_semantics<parallel>, #tpu.dimension_semantics<parallel>], iteration_bounds = array<i64: 2, 1>, scalar_prefetch = 0 : i64, scratch_operands = 0 : i64, tpu.core_type = #tpu.core_type<tc>, window_params = [{transform_indices = @transform_0, window_bounds = array<i64: 1, 3, 16, 16>}, {transform_indices = @transform_1, window_bounds = array<i64: 1, 1, 16, 16>}, {transform_indices = @transform_2, window_bounds = array<i64: 1, 1, 1, 15>}]} {
    %c0 = arith.constant 0 : index
    %c0_0 = arith.constant 0 : index
    %c0_1 = arith.constant 0 : index
    %c0_2 = arith.constant 0 : index
    %0 = vector.load %arg2[%c0, %c0_0, %c0_1, %c0_2] : memref<1x3x16x16xf32, #tpu.memory_space<vmem>>, vector<1x1x16x16xf32>
    %1 = vector.shape_cast %0 : vector<1x1x16x16xf32> to vector<16x16xf32>
    %c0_3 = arith.constant 0 : index
    %c1 = arith.constant 1 : index
    %c0_4 = arith.constant 0 : index
    %c0_5 = arith.constant 0 : index
    %2 = vector.load %arg2[%c0_3, %c1, %c0_4, %c0_5] : memref<1x3x16x16xf32, #tpu.memory_space<vmem>>, vector<1x1x16x16xf32>
    %3 = vector.shape_cast %2 : vector<1x1x16x16xf32> to vector<16x16xf32>
    %c0_6 = arith.constant 0 : index
    %c2 = arith.constant 2 : index
    %c0_7 = arith.constant 0 : index
    %c0_8 = arith.constant 0 : index
    %4 = vector.load %arg2[%c0_6, %c2, %c0_7, %c0_8] : memref<1x3x16x16xf32, #tpu.memory_space<vmem>>, vector<1x1x16x16xf32>
    %5 = vector.shape_cast %4 : vector<1x1x16x16xf32> to vector<16x16xf32>
    %c0_9 = arith.constant 0 : index
    %c0_10 = arith.constant 0 : index
    %c0_11 = arith.constant 0 : index
    %c0_12 = arith.constant 0 : index
    %6 = vector.load %arg3[%c0_9, %c0_10, %c0_11, %c0_12] : memref<1x1x16x16xf32, #tpu.memory_space<vmem>>, vector<1x1x16x16xf32>
    %7 = vector.shape_cast %6 : vector<1x1x16x16xf32> to vector<16x16xf32>
    %cst = arith.constant 2.990000e-01 : f32
    %8 = vector.broadcast %cst : f32 to vector<16x16xf32>
    %9 = arith.mulf %1, %8 : vector<16x16xf32>
    %cst_13 = arith.constant 5.870000e-01 : f32
    %10 = vector.broadcast %cst_13 : f32 to vector<16x16xf32>
    %11 = arith.mulf %3, %10 : vector<16x16xf32>
    %12 = arith.addf %9, %11 : vector<16x16xf32>
    %cst_14 = arith.constant 1.140000e-01 : f32
    %13 = vector.broadcast %cst_14 : f32 to vector<16x16xf32>
    %14 = arith.mulf %5, %13 : vector<16x16xf32>
    %15 = arith.addf %12, %14 : vector<16x16xf32>
    %cst_15 = arith.constant 9.99999974E-5 : f32
    %16 = vector.broadcast %cst_15 : f32 to vector<16x16xf32>
    %17 = arith.addf %15, %16 : vector<16x16xf32>
    %18 = math.log %17 : vector<16x16xf32>
    %19 = tpu.iota {dimensions = array<i32: 0>} : vector<16x1xi32>
    %c16_i32 = arith.constant 16 : i32
    %20 = arith.muli %arg1, %c16_i32 : i32
    %21 = vector.broadcast %20 : i32 to vector<16x1xi32>
    %22 = arith.addi %19, %21 : vector<16x1xi32>
    %c14_i32 = arith.constant 14 : i32
    %23 = vector.broadcast %c14_i32 : i32 to vector<16x1xi32>
    %24 = arith.cmpi sle, %22, %23 : vector<16x1xi32>
    %25 = vector.extract_strided_slice %18 {offsets = [0, 0], sizes = [16, 15], strides = [1, 1]} : vector<16x16xf32> to vector<16x15xf32>
    %26 = vector.extract_strided_slice %7 {offsets = [0, 0], sizes = [16, 15], strides = [1, 1]} : vector<16x16xf32> to vector<16x15xf32>
    %27 = vector.extract_strided_slice %18 {offsets = [0, 1], sizes = [16, 15], strides = [1, 1]} : vector<16x16xf32> to vector<16x15xf32>
    %28 = arith.subf %25, %27 : vector<16x15xf32>
    %29 = vector.extract_strided_slice %7 {offsets = [0, 1], sizes = [16, 15], strides = [1, 1]} : vector<16x16xf32> to vector<16x15xf32>
    %30 = arith.subf %26, %29 : vector<16x15xf32>
    %31 = math.absf %28 : vector<16x15xf32>
    %32 = math.log %31 : vector<16x15xf32>
    %cst_16 = arith.constant 1.200000e+00 : f32
    %33 = vector.broadcast %cst_16 : f32 to vector<16x15xf32>
    %34 = arith.mulf %33, %32 : vector<16x15xf32>
    %35 = math.exp %34 : vector<16x15xf32>
    %cst_17 = arith.constant 9.99999974E-5 : f32
    %36 = vector.broadcast %cst_17 : f32 to vector<16x15xf32>
    %37 = arith.addf %35, %36 : vector<16x15xf32>
    %38 = tpu.reciprocal %37 : vector<16x15xf32> -> vector<16x15xf32>
    %39 = arith.mulf %38, %30 : vector<16x15xf32>
    %40 = arith.mulf %39, %30 : vector<16x15xf32>
    %cst_18 = arith.constant 0.000000e+00 : f32
    %41 = vector.shape_cast %24 : vector<16x1xi1> to vector<16x1xi1>
    %42 = vector.broadcast %41 : vector<16x1xi1> to vector<16x15xi1>
    %43 = vector.broadcast %cst_18 : f32 to vector<16x15xf32>
    %44 = arith.select %42, %40, %43 : vector<16x15xi1>, vector<16x15xf32>
    %cst_19 = arith.constant dense<0.000000e+00> : vector<15xf32>
    %45 = vector.multi_reduction <add>, %44, %cst_19 [0] : vector<16x15xf32> to vector<15xf32>
    %46 = vector.shape_cast %45 : vector<15xf32> to vector<1x15xf32>
    %47 = vector.extract_strided_slice %25 {offsets = [0, 0], sizes = [15, 15], strides = [1, 1]} : vector<16x15xf32> to vector<15x15xf32>
    %48 = vector.extract_strided_slice %18 {offsets = [1, 0], sizes = [15, 15], strides = [1, 1]} : vector<16x16xf32> to vector<15x15xf32>
    %49 = arith.subf %47, %48 : vector<15x15xf32>
    %50 = vector.extract_strided_slice %26 {offsets = [0, 0], sizes = [15, 15], strides = [1, 1]} : vector<16x15xf32> to vector<15x15xf32>
    %51 = vector.extract_strided_slice %7 {offsets = [1, 0], sizes = [15, 15], strides = [1, 1]} : vector<16x16xf32> to vector<15x15xf32>
    %52 = arith.subf %50, %51 : vector<15x15xf32>
    %53 = math.absf %49 : vector<15x15xf32>
    %54 = math.log %53 : vector<15x15xf32>
    %cst_20 = arith.constant 1.200000e+00 : f32
    %55 = vector.broadcast %cst_20 : f32 to vector<15x15xf32>
    %56 = arith.mulf %55, %54 : vector<15x15xf32>
    %57 = math.exp %56 : vector<15x15xf32>
    %cst_21 = arith.constant 9.99999974E-5 : f32
    %58 = vector.broadcast %cst_21 : f32 to vector<15x15xf32>
    %59 = arith.addf %57, %58 : vector<15x15xf32>
    %60 = tpu.reciprocal %59 : vector<15x15xf32> -> vector<15x15xf32>
    %61 = vector.extract_strided_slice %24 {offsets = [0, 0], sizes = [15, 1], strides = [1, 1]} : vector<16x1xi1> to vector<15x1xi1>
    %62 = arith.mulf %60, %52 : vector<15x15xf32>
    %63 = arith.mulf %62, %52 : vector<15x15xf32>
    %cst_22 = arith.constant 0.000000e+00 : f32
    %64 = vector.shape_cast %61 : vector<15x1xi1> to vector<15x1xi1>
    %65 = vector.broadcast %64 : vector<15x1xi1> to vector<15x15xi1>
    %66 = vector.broadcast %cst_22 : f32 to vector<15x15xf32>
    %67 = arith.select %65, %63, %66 : vector<15x15xi1>, vector<15x15xf32>
    %cst_23 = arith.constant dense<0.000000e+00> : vector<15xf32>
    %68 = vector.multi_reduction <add>, %67, %cst_23 [0] : vector<15x15xf32> to vector<15xf32>
    %69 = vector.shape_cast %68 : vector<15xf32> to vector<1x15xf32>
    %70 = arith.addf %46, %69 : vector<1x15xf32>
    %c0_24 = arith.constant 0 : index
    %c0_25 = arith.constant 0 : index
    %c0_26 = arith.constant 0 : index
    %c0_27 = arith.constant 0 : index
    %71 = vector.load %arg4[%c0_24, %c0_25, %c0_26, %c0_27] : memref<1x1x1x15xf32, #tpu.memory_space<vmem>>, vector<1x1x1x15xf32>
    %72 = vector.shape_cast %71 : vector<1x1x1x15xf32> to vector<1x15xf32>
    %73 = vector.shape_cast %70 : vector<1x15xf32> to vector<1x1x1x15xf32>
    tpu.vector_store %arg4[%c0_24, %c0_25, %c0_26, %c0_27], %73 {strides = array<i32>} : memref<1x1x1x15xf32, #tpu.memory_space<vmem>>, vector<1x1x1x15xf32>,
    return
  }
  func.func @transform_0(%arg0: i32, %arg1: i32) -> (i32, i32, i32, i32) {
    %c0_i32 = arith.constant 0 : i32
    %c0_i32_0 = arith.constant 0 : i32
    %c0_i32_1 = arith.constant 0 : i32
    return %arg0, %c0_i32, %arg1, %c0_i32_0 : i32, i32, i32, i32
  }
  func.func @transform_1(%arg0: i32, %arg1: i32) -> (i32, i32, i32, i32) {
    %c0_i32 = arith.constant 0 : i32
    %c0_i32_0 = arith.constant 0 : i32
    %c0_i32_1 = arith.constant 0 : i32
    return %arg0, %c0_i32, %arg1, %c0_i32_0 : i32, i32, i32, i32
  }
  func.func @transform_2(%arg0: i32, %arg1: i32) -> (i32, i32, i32, i32) {
    %c0_i32 = arith.constant 0 : i32
    %c0_i32_0 = arith.constant 0 : i32
    %c0_i32_1 = arith.constant 0 : i32
    return %arg0, %arg1, %c0_i32, %c0_i32_0 : i32, i32, i32, i32
  }
}

</mosaic_0001>

<bundles_post_ra>
// kernel: tpu_custom_call.1
= control target key start
LH: loop header
LB: loop body
LE: loop exit
PB: predicated region body
PF: predicated region fallthrough
CT: control target
= control target key end

     0   :  { %7 = vsyncpa [#allocation3], 0  ;;  %s1021_s0 = inlined_call_operand.hbm [shape: f32[2,3,16,16], index: 0, kind: input, shape index: {}]   ;;  %s1022_s1 = inlined_call_operand.hbm [shape: f32[2,1,16,16], index: 1, kind: input, shape index: {}]   ;;  %s1023_s2 = inlined_call_operand.hbm [shape: f32[2,1,1,15], index: 2, kind: output, shape index: {}]  }
   0x1   :  { %9 = vsyncpa [#allocation3 + $0x1], 0 }
   0x2   :  { %10 = vsyncpa [#allocation6], 0 }
   0x3   :  { %12 = vsyncpa [#allocation6 + $0x1], 0 }
   0x4   :  { %13 = vsyncpa [#allocation4], 0 }
   0x5   :  { %15 = vsyncpa [#allocation4 + $0x1], 0  ;;  %s772_s9 = smov 0   ;;  %s774_s10 = smov 0  }
   0x6   :  { %s776_s11 = smov 0   ;;  %s778_s12 = smov 0  }
   0x7   :  { %s780_s13 = smov 0   ;;  %s782_s14 = smov 0  }
   0x8 LB: > { %s484_s15 = sadd.s32 4294967295, %s749_s14   ;;  %s485_s16 = sadd.s32 4294967294, %s749_s14   ;;  %s749_s14 = sphi %s782_s14, %s21_s14   ;;  %s745_s13 = sphi %s780_s13, %s1041_s13   ;;  %s741_s12 = sphi %s778_s12, %s1040_s12   ;;  %s737_s11 = sphi %s776_s11, %s1039_s11   ;;  %s733_s10 = sphi %s774_s10, %s1038_s10   ;;  %s729_s9 = sphi %s772_s9, %s1037_s9  }
   0x9   : > { %s33_s17 = sadd.s32 1, %s745_s13  ;;  %s42_s18 = sadd.s32 1, %s737_s11 }
   0xa   : > { %p35_p0 = scmp.ge.s32.totalorder %s33_s17, 2  ;;  %p49_p1 = scmp.ne.s32.totalorder %s737_s11, %s733_s10 }
   0xb   : > { %p50_p2 = scmp.eq.s32.totalorder %s749_s14, 0  ;;  %p55_p3 = scmp.ne.s32.totalorder %s733_s10, %s729_s9 }
   0xc   : > { %s1043_s17 = smov (%p35_p0, %s33_s17), 0  ;;  %p56_p5 = scmp.eq.s32.totalorder %s484_s15, 0 }
   0xd   : > { %p813_p4 = por %p50_p2, %p49_p1  ;;  %s37_s20 = ssub.s32 %s745_s13, %s1043_s17 }
   0xe   : > { %p109_p6 = scmp.eq.s32.totalorder %s484_s15, 1  ;;  %p40_p7 = scmp.eq.s32.totalorder %s37_s20, 0 }
   0xf   : > { %p819_p8 = por %p56_p5, %p55_p3  ;;  %p115_p10 = scmp.eq.s32.totalorder %s485_s16, 1 }
  0x10   : > { %p823_p9 = por %p109_p6, %p49_p1  ;;  %p522_p13 = scmp.lt.s32.totalorder %s749_s14, 2 }
  0x11   : > { %s1027_s21 = scalar_select %p819_p8, 1, 0 }
  0x12   : > { %s1028_s22 = scalar_select %p823_p9, 1, 0 }
  0x13   : > { %s828_s23 = scalar_select %p40_p7, %s737_s11, %s42_s18  }
  0x14   : > { %p830_p11 = por %p115_p10, %p55_p3  ;;  %s837_s25 = sand.u32 1, %s737_s11  }
  0x15   : > { %s502_s26 = smul.u32 48, %s837_s25  ;;  %p843_p0 = pnand %p522_p13, %p813_p4 }
  0x16   : > { %s1029_s24 = scalar_select %p830_p11, 1, 0 }
  0x17   : > { %s503_s27 = smul.u32 768, %s745_s13  ;;  %s139_s4 = scalar_lea.vmem [#allocation2], %s502_s26 }
  0x18   : > { %s148_s5 = sshll.u32 %s139_s4, 4  ;;  %s136_s6 = scalar_lea.sflag [#allocation3], %s837_s25  ;;  %s852_s5 = int_to_ptr.vmem [resolvable:$true] %s148_s5 }
  0x19   : > { %s850_s3 = scalar_lea.hbm %s1021_s0, %s503_s27  ;;  %p605_p3 = pneg %p843_p0 }
  0x1a   : > { %s603_s7 = scalar_lea.hbm %s850_s3, 768  ;;  %s608_s16 = scalar_lea.hbm %s1021_s0, 1536 }
  0x1b   : > { %p604_p2 = scmp.ne.s32.totalorder %s850_s3, %s603_s7  ;;  %p609_p6 = scmp.lt.u32.totalorder %s850_s3, %s1021_s0 }
  0x1c   : > { %p610_p7 = scmp.lt.u32.totalorder %s608_s16, %s603_s7  ;;  %p612_p13 = scmp.lt.u32.totalorder %s603_s7, %s850_s3 }
  0x1d   : > { %p606_p4 = pnand %p605_p3, %p604_p2 }
  0x1e   : > { %p611_p10 = por %p610_p7, %p609_p6 }
  0x1f   : > { %p607_p5 = pneg %p606_p4 }
  0x20   : > { %p613_p12 = por %p612_p13, %p611_p10 }
  0x22   : > { %p614_p1 = pnand %p613_p12, %p607_p5 }
  0x24   : > { %617 = shalt.err (!%p614_p1)
}
  0x25   : > { %s618_s20 = scalar_lea.vmem %s852_s5, 768  ;;  %s751_s26 = smov [#allocation2]  }
  0x26   : > { %p619_p2 = scmp.ne.s32.totalorder %s852_s5, %s618_s20  ;;  %s623_s27 = sshll.u32 %s751_s26, 4  ;;  %s624_s27 = int_to_ptr.vmem [resolvable:$false] %s623_s27 }
  0x27   : > { %s625_s29 = scalar_lea.vmem %s624_s27, 1536  ;;  %p626_p9 = scmp.lt.s32.totalorder %s852_s5, %s624_s27 }
  0x28   : > { %p621_p4 = pnand %p619_p2, %p605_p3  ;;  %p627_p6 = scmp.lt.s32.totalorder %s625_s29, %s618_s20 }
  0x2a   : > { %p622_p11 = pneg %p621_p4  ;;  %p628_p7 = por %p627_p6, %p626_p9 }
  0x2c   : > { %p629_p10 = pnand %p628_p7, %p622_p11 }
  0x2e   : > { %632 = shalt.err (!%p629_p10)
}
  0x2f   : > { %s752_s30 = smov 128   ;;  %s753_s4 = smov 8  }
  0x30   : > { %514 = dma.hbm_to_vmem [thread:$0]  (!%p843_p0), %s850_s3, 768, %s852_s5, %s136_s6, %s752_s30, %s752_s30, %s753_s4  }
  0x31   : > { %p179_p9 = scmp.lt.s32.totalorder %s749_s14, 3  ;;  %s489_s7 = sshll.u32 %s837_s25, 4 }
  0x32   : > { %s501_s8 = sshll.u32 %s745_s13, 8  ;;  %p1031_p11 = scmp.ge.s32.totalorder %s749_s14, 1 }
  0x33   : > { %s898_s19 = scalar_lea.hbm %s1022_s1, %s501_s8  ;;  %s162_s20 = scalar_lea.vmem [#allocation5], %s489_s7 }
  0x34   : > { %p891_p12 = pnand %p1031_p11, %p179_p9  ;;  %s171_s26 = sshll.u32 %s162_s20, 4  ;;  %s900_s26 = int_to_ptr.vmem [resolvable:$true] %s171_s26 }
  0x35   : > { %s159_s3 = scalar_lea.sflag [#allocation6], %s837_s25  ;;  %s633_s5 = scalar_lea.hbm %s898_s19, 256 }
  0x36   : > { %p634_p1 = scmp.ne.s32.totalorder %s898_s19, %s633_s5  ;;  %s638_s29 = scalar_lea.hbm %s1022_s1, 512 }
  0x37   : > { %p639_p2 = scmp.lt.u32.totalorder %s898_s19, %s1022_s1  ;;  %p640_p4 = scmp.lt.u32.totalorder %s638_s29, %s633_s5 }
  0x38   : > { %p636_p5 = pnand %p634_p1, %p605_p3  ;;  %p642_p7 = scmp.lt.u32.totalorder %s633_s5, %s898_s19 }
  0x39   : > { %p641_p6 = por %p640_p4, %p639_p2 }
  0x3a   : > { %p637_p13 = pneg %p636_p5 }
  0x3b   : > { %p643_p10 = por %p642_p7, %p641_p6 }
  0x3d   : > { %p644_p9 = pnand %p643_p10, %p637_p13 }
  0x3f   : > { %647 = shalt.err (!%p644_p9)
}
  0x40   : > { %s648_s7 = scalar_lea.vmem %s900_s26, 256  ;;  %s754_s18 = smov [#allocation5]  }
  0x41   : > { %p649_p11 = scmp.ne.s32.totalorder %s900_s26, %s648_s7  ;;  %s653_s20 = sshll.u32 %s754_s18, 4  ;;  %s654_s20 = int_to_ptr.vmem [resolvable:$false] %s653_s20 }
  0x42   : > { %s655_s6 = scalar_lea.vmem %s654_s20, 512  ;;  %p656_p8 = scmp.lt.s32.totalorder %s900_s26, %s654_s20 }
  0x43   : > { %p651_p1 = pnand %p649_p11, %p605_p3  ;;  %p657_p2 = scmp.lt.s32.totalorder %s655_s6, %s648_s7 }
  0x45   : > { %p652_p5 = pneg %p651_p1  ;;  %p658_p4 = por %p657_p2, %p656_p8 }
  0x47   : > { %p659_p6 = pnand %p658_p4, %p652_p5 }
  0x49   : > { %662 = shalt.err (!%p659_p6)
}
  0x4a   : > { %517 = dma.hbm_to_vmem [thread:$0]  (!%p843_p0), %s898_s19, 256, %s900_s26, %s159_s3, %s752_s30, %s752_s30, %s753_s4  }
  0x4b   : > { %183 = sbr.rel (%p891_p12) target bundleno = 307 (0x133), region = 28  ;;  %s934_s5 = sand.u32 (!%p891_p12), 1, %s733_s10  }
  0x4c   : > { %s504_s27 = smul.u32 (!%p891_p12), 48, %s934_s5  ;;  %s186_s29 = scalar_lea.sflag (!%p891_p12), [#allocation3], %s934_s5 }
  0x4d   : > { %p1033_p8 = scmp.ne.s32.totalorder (!%p891_p12), %s1027_s21, 0 }
  0x4e   : > { %s189_s28 = scalar_lea.vmem (!%p891_p12), [#allocation2], %s504_s27 }
  0x52   : > { %716 = dma.done.wait (%p1033_p8), %s186_s29, 768  }
  0x53   : > { %718 = vsyncadd (%p1033_p8), %s186_s29, 4294966528  ;;  %s493_s25 = sshll.u32 %s934_s5, 4  ;;  %s195_s30 = scalar_lea.sflag [#allocation6], %s934_s5 }
  0x54   : > { %s198_s4 = scalar_lea.vmem [#allocation5], %s493_s25 }
  0x55   : > { %720 = dma.done.wait (%p1033_p8), %s195_s30, 256  }
  0x56   : > { %722 = vsyncadd (%p1033_p8), %s195_s30, 4294967040  ;;  %v226_v0 = vld [vmem:[%s189_s28 + $0x8] sm:$0xff]  ;;  %v495_v1 = vld [vmem:[%s189_s28 + $0x18] sm:$0xff]  ;;  %s755_s15 = smov 127   ;;  %vm316_vm0 = vcmask 1046528   ;;  %v251_v58 = vlaneseq  ;;  %vm354_vm2 = vcmask 120832  }
  0x57   : > { %v497_v2 = vld [vmem:[%s189_s28 + $0x28] sm:$0xff]  ;;  %v236_v3 = vmul.f32 0.299, %v226_v0  ;;  %v238_v4 = vmul.f32 0.587, %v495_v1  ;;  %v225_v6 = vld [vmem:[%s189_s28] sm:$0xff] }
  0x58   : > { %v242_v5 = vmul.f32 0.114, %v497_v2  ;;  %v494_v7 = vld [vmem:[%s189_s28 + $0x10] sm:$0xff]  ;;  %v496_v8 = vld [vmem:[%s189_s28 + $0x20] sm:$0xff]  ;;  %v235_v10 = vmul.f32 0.299, %v225_v6 }
  0x59   : > { %v240_v9 = vadd.f32 %v238_v4, %v236_v3  ;;  %v237_v11 = vmul.f32 0.587, %v494_v7  ;;  %v241_v12 = vmul.f32 0.114, %v496_v8  ;;  %v948_v13 = vld [vmem:[%s198_s4 + $0x8] sm:$0xff]  ;;  %v951_v16 = vld [vmem:[%s198_s4] sm:$0xff] }
  0x5a   : > { %274 = vrot.lane.b32.xlu1 %v948_v13, %s755_s15  ;;  %v325_v53 = vrot.slane %v948_v13, 1  ;;  %v324_v54 = vrot.slane %v951_v16, 1  ;;  %v252_v0 = vshrl.u32 %v251_v58, 7  ;;  %vm306_vm3 = vcmask 121856   ;;  %s498_s21 = sshll.u32 %s741_s12, 4  ;;  %s222_s19 = scalar_lea.vmem [#allocation7], %s934_s5 }
  0x5b   : > { %v244_v14 = vadd.f32 %v242_v5, %v240_v9  ;;  %v239_v15 = vadd.f32 %v237_v11, %v235_v10  ;;  %s380_s26 = sshll.u32 %s222_s19, 4  ;;  %vm364_vm4 = vcmask 114688   ;;  %s972_s16 = scalar_lea.hbm %s1023_s2, %s498_s21  ;;  %s974_s26 = int_to_ptr.vmem [resolvable:$true] %s380_s26 }
  0x5c   : > { %v330_v59 = vsub.f32 %v948_v13, %v325_v53  ;;  %v326_v60 = vsel %vm316_vm0, %v324_v54, %v325_v53  ;;  %v253_v4 = vadd.s32 8, %v252_v0  ;;  %s367_s7 = scalar_lea.sflag [#allocation4], %s934_s5  ;;  %s663_s18 = scalar_lea.vmem %s974_s26, 16 }
  0x5d   : > { %v246_v17 = vadd.f32 0.0001, %v244_v14  ;;  %v243_v18 = vadd.f32 %v241_v12, %v239_v15  ;;  %v329_v63 = vsub.f32 %v951_v16, %v326_v60  ;;  %p664_p0 = scmp.ne.s32.totalorder %s974_s26, %s663_s18  ;;  %p1034_p3 = scmp.ne.s32.totalorder %s1028_s22, 0 }
  0x5e   : > { %272 = vrot.lane.b32.xlu1 %v951_v16, %s755_s15  ;;  %vm259_vm1 = vcmp.le.s32.totalorder %v253_v4, 14  ;;  %s756_s12 = smov [#allocation7]  }
  0x5f   : > { %575 = vlog2.f32 %v246_v17  ;;  %v245_v19 = vadd.f32 0.0001, %v243_v18  ;;  %p665_p12 = pnand %p664_p0, %p1034_p3  ;;  %s667_s20 = sshll.u32 %s756_s12, 4  ;;  %s668_s20 = int_to_ptr.vmem [resolvable:$false] %s667_s20 }
  0x60   : > { %s669_s6 = scalar_lea.vmem %s668_s20, 32  ;;  %p670_p7 = scmp.lt.s32.totalorder %s974_s26, %s668_s20 }
  0x61   : > { %577 = vlog2.f32 %v245_v19  ;;  %p666_p13 = pneg %p665_p12  ;;  %p671_p10 = scmp.lt.s32.totalorder %s669_s6, %s663_s18 }
  0x63   : > { %p672_p9 = por %p671_p10, %p670_p7 }
  0x65   : > { %p673_p11 = pnand %p672_p9, %p666_p13 }
  0x69   : > { %v576_v20 = vpop.eup %575 }
  0x6a   : > { %v250_v21 = vmul.f32 0.6931472, %v576_v20 }
  0x6b   : > { %v578_v22 = vpop.eup %577 }
  0x6c   : > { %264 = vrot.lane.b32.xlu0 %v250_v21, %s755_s15  ;;  %v248_v23 = vmul.f32 0.6931472, %v578_v22  ;;  %v318_v24 = vrot.slane %v250_v21, 1 }
  0x6e   : > { %v317_v25 = vrot.slane %v248_v23, 1  ;;  %v323_v26 = vsub.f32 %v250_v21, %v318_v24 }
  0x70   : > { %262 = vrot.lane.b32.xlu0 %v248_v23, %s755_s15  ;;  %v319_v27 = vsel %vm316_vm0, %v317_v25, %v318_v24  ;;  %v332_v29 = vand.u32 2147483647, %v323_v26 }
  0x71   : > { %v322_v28 = vsub.f32 %v248_v23, %v319_v27 }
  0x72   : > { %579 = vlog2.f32 %v332_v29 }
  0x73   : > { %v331_v30 = vand.u32 2147483647, %v322_v28 }
  0x75   : > { %581 = vlog2.f32 %v331_v30 }
  0x7c   : > { %v580_v31 = vpop.eup %579 }
  0x7d   : > { %v336_v33 = vmul.f32 0.6931472, %v580_v31 }
  0x7f   : > { %v582_v32 = vpop.eup %581  ;;  %v338_v35 = vmul.f32 1.2, %v336_v33 }
  0x80   : > { %v334_v34 = vmul.f32 0.6931472, %v582_v32 }
  0x81   : > { %v341_v37 = vmul.f32 1.442695, %v338_v35 }
  0x82   : > { %v337_v36 = vmul.f32 1.2, %v334_v34 }
  0x83   : > { %583 = vpow2.f32 %v341_v37 }
  0x84   : > { %v339_v38 = vmul.f32 1.442695, %v337_v36 }
  0x86   : > { %585 = vpow2.f32 %v339_v38 }
  0x8d   : > { %v584_v44 = vpop.eup %583 }
  0x8e   : > { %v344_v47 = vadd.f32 0.0001, %v584_v44 }
  0x90   : > { %v586_v46 = vpop.eup %585 }
  0x91   : > { %v343_v48 = vadd.f32 0.0001, %v586_v46 }
  0xcc   : > { %v275_v12 = vpop.permute.xlu1 %274 }
  0xcd   : > { %v279_v18 = vsub.f32 %v948_v13, %v275_v12 }
  0xd0   : > { %v273_v19 = vpop.permute.xlu1 %272 }
  0xde   : > { %v265_v39 = vpop.permute.xlu0 %264 }
  0xdf   : > { %v269_v40 = vsub.f32 %v250_v21, %v265_v39 }
  0xe1   : > { %v281_v41 = vand.u32 2147483647, %v269_v40 }
  0xe2   : > { %v263_v42 = vpop.permute.xlu0 %262 }
  0xe3   : > { %587 = vlog2.f32 %v281_v41  ;;  %v268_v43 = vsub.f32 %v248_v23, %v263_v42  ;;  %v278_v23 = vsub.f32 %v951_v16, %v273_v19 }
  0xe5   : > { %v280_v45 = vand.u32 2147483647, %v268_v43 }
  0xe7   : > { %589 = vlog2.f32 %v280_v45 }
  0xe8   : > { %591 = vrcp.f32 %v344_v47 }
  0xe9   : > { %593 = vrcp.f32 %v343_v48 }
  0xed   : > { %v588_v49 = vpop.eup %587 }
  0xee   : > { %v285_v50 = vmul.f32 0.6931472, %v588_v49 }
  0xf0   : > { %v287_v51 = vmul.f32 1.2, %v285_v50 }
  0xf1   : > { %v590_v52 = vpop.eup %589 }
  0xf2   : > { %v290_v55 = vmul.f32 1.442695, %v287_v51  ;;  %v283_v56 = vmul.f32 0.6931472, %v590_v52  ;;  %v592_v61 = vpop.eup %591 }
  0xf3   : > { %v594_v1 = vpop.eup %593  ;;  %v348_v2 = vmul.f32 %v592_v61, %v330_v59 }
  0xf4   : > { %595 = vpow2.f32 %v290_v55  ;;  %v286_v57 = vmul.f32 1.2, %v283_v56  ;;  %v347_v3 = vmul.f32 %v594_v1, %v329_v63 }
  0xf5   : > { %v350_v5 = vmul.f32 %v348_v2, %v330_v59 }
  0xf6   : > { %v288_v62 = vmul.f32 1.442695, %v286_v57  ;;  %v349_v8 = vmul.f32 %v347_v3, %v329_v63 }
  0xf7   : > { %v352_v9 = vsel %vm259_vm1, %v350_v5, 0.0 }
  0xf8   : > { %597 = vpow2.f32 %v288_v62  ;;  %v353_v14 = vsel %vm306_vm3, %v349_v8, 0.0  ;;  %v355_v15 = vsel %vm354_vm2, %v352_v9, 0.0 }
  0xf9   : > { %v356_v17 = vadd.f32 %v355_v15, %v353_v14 }
  0xfb   : > { %v357_v21 = vrot.slane %v356_v17, 4 }
  0xfd   : > { %v358_v26 = vadd.f32 %v357_v21, %v356_v17 }
  0xfe   : > { %v596_v6 = vpop.eup %595 }
  0xff   : > { %v293_v7 = vadd.f32 0.0001, %v596_v6  ;;  %v359_v30 = vrot.slane %v358_v26, 2 }
 0x101   : > { %599 = vrcp.f32 %v293_v7  ;;  %v360_v33 = vadd.f32 %v359_v30, %v358_v26 }
 0x102   : > { %v598_v10 = vpop.eup %597 }
 0x103   : > { %v292_v11 = vadd.f32 0.0001, %v598_v10  ;;  %v361_v16 = vrot.slane %v360_v33, 1 }
 0x105   : > { %601 = vrcp.f32 %v292_v11  ;;  %v362_v38 = vadd.f32 %v361_v16, %v360_v33 }
 0x10b   : > { %v600_v20 = vpop.eup %599 }
 0x10c   : > { %v297_v22 = vmul.f32 %v600_v20, %v279_v18 }
 0x10e   : > { %v299_v24 = vmul.f32 %v297_v22, %v279_v18 }
 0x10f   : > { %v602_v25 = vpop.eup %601 }
 0x110   : > { %v296_v27 = vmul.f32 %v602_v25, %v278_v23  ;;  %v305_v28 = vsel %vm259_vm1, %v299_v24, 0.0 }
 0x111   : > { %v308_v31 = vsel %vm306_vm3, %v305_v28, 0.0 }
 0x112   : > { %v298_v29 = vmul.f32 %v296_v27, %v278_v23 }
 0x114   : > { %v307_v13 = vsel %vm306_vm3, %v298_v29, 0.0 }
 0x115   : > { %v309_v32 = vadd.f32 %v308_v31, %v307_v13 }
 0x117   : > { %v310_v34 = vrot.slane %v309_v32, 4 }
 0x119   : > { %v311_v35 = vadd.f32 %v310_v34, %v309_v32 }
 0x11b   : > { %v312_v36 = vrot.slane %v311_v35, 2 }
 0x11d   : > { %v313_v37 = vadd.f32 %v312_v36, %v311_v35 }
 0x11f   : > { %v314_v39 = vrot.slane %v313_v37, 1 }
 0x121   : > { %v315_v40 = vadd.f32 %v314_v39, %v313_v37 }
 0x123   : > { %v363_v41 = vadd.f32 %v362_v38, %v315_v40 }
 0x125   : > { %365 = vst.msk [vmem:[%s222_s19] sm:$0x1] %vm364_vm4, %v363_v41 }
 0x126   : > { %676 = shalt.err (!%p673_p11)
}
 0x127   : > { %s677_s5 = scalar_lea.hbm %s972_s16, 16  ;;  %s681_s28 = scalar_lea.hbm %s1023_s2, 32 }
 0x128   : > { %p678_p1 = scmp.ne.s32.totalorder %s972_s16, %s677_s5  ;;  %p682_p4 = scmp.lt.u32.totalorder %s972_s16, %s1023_s2 }
 0x129   : > { %p683_p6 = scmp.lt.u32.totalorder %s681_s28, %s677_s5  ;;  %p685_p0 = scmp.lt.u32.totalorder %s677_s5, %s972_s16 }
 0x12a   : > { %p679_p5 = pnand %p678_p1, %p1034_p3 }
 0x12b   : > { %p684_p8 = por %p683_p6, %p682_p4 }
 0x12c   : > { %p680_p2 = pneg %p679_p5 }
 0x12d   : > { %p686_p12 = por %p685_p0, %p684_p8 }
 0x12f   : > { %p687_p13 = pnand %p686_p12, %p680_p2 }
 0x131   : > { %690 = shalt.err (!%p687_p13)
}
 0x132   : > { %509 = dma.vmem_to_hbm [thread:$0]  (%p1034_p3), %s974_s26, 16, %s972_s16, %s367_s7  }
 0x133 PF: > { %s392_s4 = sand.u32 1, %s729_s9   ;;  %p1035_p7 = scmp.ne.s32.totalorder %s1029_s24, 0 }
 0x134   : > { %p1036_p10 = scmp.ge.s32.totalorder %s749_s14, 2  ;;  %s393_s15 = scalar_lea.sflag [#allocation4], %s392_s4 }
 0x136   : > { %p519_p9 = pnand %p1036_p10, %p1035_p7 }
 0x138   : > { %724 = dma.done.wait (!%p519_p9), %s393_s15, 16  }
 0x139   : > { %726 = vsyncadd (!%p519_p9), %s393_s15, 4294967280  ;;  %s21_s14 = sadd.s32 1, %s749_s14   ;;  %s1037_s9 = smov %s733_s10 }
 0x13a   : > { %p18_p11 = scmp.ge.s32.totalorder %s21_s14, 4   ;;  %s1038_s10 = smov %s737_s11 }
 0x13b   : > { %s1039_s11 = smov %s828_s23  ;;  %s1040_s12 = smov %s745_s13 }
 0x13c   : > { %s1041_s13 = smov %s1043_s17  ;;  %20 = sbr.rel (!%p18_p11) target bundleno = 8 (0x8), region = 88 }
 0x143   :  { %397 = vsyncpa [#allocation3], 1 }
 0x144   :  { %399 = vsyncpa [#allocation3 + $0x1], 1 }
 0x145   :  { %400 = vsyncpa [#allocation6], 1 }
 0x146   :  { %402 = vsyncpa [#allocation6 + $0x1], 1 }
 0x147   :  { %403 = vsyncpa [#allocation4], 1 }
 0x148   :  { %405 = vsyncpa [#allocation4 + $0x1], 1 }

</bundles_post_ra>
